<compile_context>
chip_gen: v7x
topology: tpu7x:2x2x1
jax: 0.10.0
libtpu: 0.0.40
codegen_flags: <defaults>
</compile_context>

<pallas_src>
import functools

import numpy as np
import jax
import jax.numpy as jnp
from jax.experimental import pallas as pl
from jax.experimental.pallas import tpu as pltpu

NEG_INF = -1e12  # constant.INFINITY_NUMBER


# ----------------------------------------------------------------------------
# Weight slab packing (done ONCE at init time)
# ----------------------------------------------------------------------------
def _pack_slab(pieces):
    """pieces: list of (name, 2-D f32 array). Returns (slab (R, lane_w), offsets)."""
    lane_w = max(int(a.shape[1]) for _, a in pieces)
    lane_w = ((lane_w + 127) // 128) * 128
    blocks, offs, r = [], {}, 0
    for name, a in pieces:
        a = jnp.asarray(a, jnp.float32)
        nr, nc = int(a.shape[0]), int(a.shape[1])
        nr_pad = ((nr + 7) // 8) * 8              # 8-aligned sublane start per piece
        blk = jnp.zeros((nr_pad, lane_w), jnp.float32).at[:nr, :nc].set(a)
        blocks.append(blk)
        offs[name] = (r, nr, nc)
        r += nr_pad
    return jnp.concatenate(blocks, axis=0), offs


# ----------------------------------------------------------------------------
# Fused Pallas kernel: encoder -> GCN layers -> pools -> MLP -> classifier
# ----------------------------------------------------------------------------
def _fused_kernel(x2d_ref, ahat_ref, masks_ref, invd_ref, relatt_ref, slab_ref,
                  out_ref, *, offs, dims, neg_inf):
    f32 = jnp.float32
    B, S = dims["B"], dims["S"]
    d_model, mem = dims["d_model"], dims["mem"]
    L, ML = dims["num_layers"], dims["mlp_layers"]

    def piece(name, row0=0, nrows=None, ncols=None):
        r, nr, nc = offs[name]
        nrows = nr if nrows is None else nrows
        ncols = nc if ncols is None else ncols
        return slab_ref[r + row0: r + row0 + nrows, :ncols]   # static slice -> load

    # ---- encoder stand-in (TODO(synk): bi-LSTM + pack_padded_sequence
    #      replaced by a deterministic tanh linear projection) ----
    x = jnp.tanh(jnp.dot(x2d_ref[...], piece("enc_w"),
                         preferred_element_type=f32) + piece("enc_b"))   # (B*S, d_model)

    # ---- GCN layers:  relu((Â x) @ W + 2b / denom),  Â = D⁻¹(A+I) block-diag ----
    a_hat = ahat_ref[...]                                                # (B*S, B*S)
    invd = invd_ref[...]                                                 # (B*S, 1)
    for l in range(L):
        ax = jnp.dot(a_hat, x, preferred_element_type=f32)
        x = jnp.maximum(jnp.dot(ax, piece(f"gcn_w{l}"), preferred_element_type=f32)
                        + piece(f"gcn_b{l}") * invd, 0.0)                # (B*S, mem)

    # ---- masked max pools (pool(h, mask, 'max') == masked_fill(-INF).max(1)) ----
    x3 = x.reshape(B, S, mem)

    def mpool(mask):  # mask (B, S), nonzero = masked
        return jnp.max(jnp.where(mask[:, :, None] != 0.0, neg_inf, x3), axis=1)

    subj_pool = mpool(masks_ref[0])                                      # (B, mem)
    obj_pool = mpool(masks_ref[1])
    gcn_pool = mpool(masks_ref[2])

    # ---- out_mlp: concat [rel_att | subj | obj | pool] fused via split-weight
    #      dots (all four row blocks are static slices of the single slab) ----
    h = (jnp.dot(relatt_ref[...], piece("mlp_w0", 0, d_model), preferred_element_type=f32)
         + jnp.dot(subj_pool, piece("mlp_w0", d_model, mem), preferred_element_type=f32)
         + jnp.dot(obj_pool, piece("mlp_w0", d_model + mem, mem), preferred_element_type=f32)
         + jnp.dot(gcn_pool, piece("mlp_w0", d_model + 2 * mem, mem), preferred_element_type=f32)
         + piece("mlp_b0"))
    h = jnp.maximum(h, 0.0)
    for l in range(1, ML):
        h = jnp.maximum(jnp.dot(h, piece(f"mlp_w{l}"), preferred_element_type=f32)
                        + piece(f"mlp_b{l}"), 0.0)

    # ---- classifier (weight pre-padded to 128 lanes -> lane-dense store) ----
    out_ref[...] = jnp.dot(h, piece("cls_w"), preferred_element_type=f32) + piece("cls_b")


def fused_forward(x2d, a_hat, masks, inv_denom, rel_att, slab, offs, opt):
    """Single grid-less pallas_call (whole-array VMEM blocks, no pipelining)."""
    B = rel_att.shape[0]
    S = x2d.shape[0] // B
    nc = opt["num_class"]
    ncp = ((nc + 127) // 128) * 128
    dims = dict(B=B, S=S, d_model=2 * opt["rnn_hidden"], mem=opt["hidden_dim"],
                num_layers=opt["num_layers"], mlp_layers=opt["mlp_layers"])
    kernel = functools.partial(_fused_kernel, offs=offs, dims=dims, neg_inf=NEG_INF)
    vmem = pltpu.MemorySpace.VMEM
    return pl.pallas_call(
        kernel,
        out_shape=jax.ShapeDtypeStruct((B, ncp), jnp.float32),
        in_specs=[pl.BlockSpec(memory_space=vmem) for _ in range(6)],
        out_specs=pl.BlockSpec(memory_space=vmem),
    )(x2d, a_hat, masks, inv_denom, rel_att, slab)


# ----------------------------------------------------------------------------
# Parameters (deterministic, in-script)
# ----------------------------------------------------------------------------
def init_params(key, opt):
    keys = iter(jax.random.split(key, 48))

    def u(shape, scale=0.1):
        return jax.random.uniform(next(keys), shape, jnp.float32, -scale, scale)

    d_model = 2 * opt["rnn_hidden"]
    hd = opt["heads"] * opt["d_k"]
    mem = opt["hidden_dim"]
    elmo_in = opt["elmo_dim"] + opt["pos_dim"] + 2 * opt["dis_dim"] + opt["mesh_dim"]
    bert_in = opt["bert_dim"] + opt["pos_dim"] + 2 * opt["dis_dim"] + opt["mesh_dim"]
    mlp_in = d_model + 3 * mem

    p = {
        "mesh_emb": u((opt["mesh_size"], opt["mesh_dim"]), 1.0),
        "word_emb": u((opt["word_size"], opt["word_dim"]), 1.0),
        "pos_emb": u((opt["pos_size"], opt["pos_dim"]), 1.0),
        "dis_emb": u((2 * opt["dis_range"] + 1, opt["dis_dim"]), 1.0),
        # TODO(synk): ELMo / BERT pretrained encoders have no Pallas equivalent;
        # replaced by deterministic linear projections of the word embeddings.
        "elmo_proj": u((opt["word_dim"], opt["elmo_dim"])),
        "bert_proj": u((opt["word_dim"], opt["bert_dim"])),
        # TODO(synk): nn.LSTM + pack_padded_sequence stand-in (tanh linear to 2*rnn_hidden).
        "elmo_enc_w": u((elmo_in, d_model)), "elmo_enc_b": u((1, d_model)),
        # BERT-branch params kept for module fidelity; they never reach the
        # returned logits (Sk=1 attention output is independent of Q).
        "bert_enc_w": u((bert_in, d_model)), "bert_enc_b": u((1, d_model)),
        # relation vectors (replaces relationVector_1000.txt file read)
        "rel_matrix": u((opt["num_rel"], opt["rel_dim"]), 1.0),
        # slf_rnn_attn (MultiHeadAttention(heads, d_model, d_k, d_k))
        "rnn_attn": {
            "wq": u((d_model, hd)), "bq": u((1, hd)),
            "wk": u((opt["rel_dim"], hd)), "bk": u((1, hd)),
            "wv": u((opt["rel_dim"], hd)), "bv": u((1, hd)),
            "wo": u((hd, d_model)), "bo": u((1, d_model)),
        },
        "gcn_w": [u((d_model if l == 0 else mem, mem)) for l in range(opt["num_layers"])],
        "gcn_b": [u((1, mem)) for _ in range(opt["num_layers"])],
        "mlp_w": [u((mlp_in, mem)), u((mem, mem))][: opt["mlp_layers"]],
        "mlp_b": [u((1, mem)), u((1, mem))][: opt["mlp_layers"]],
        "cls_w": u((mem, opt["num_class"])),
        "cls_b": u((1, opt["num_class"])),
    }
    return p


def build_fused(params, opt):
    """Precompute (once) the weight slab, padded classifier, and the fused
    relation-attention table; returns (device consts dict, static offsets)."""
    nc = opt["num_class"]
    ncp = ((nc + 127) // 128) * 128
    mem = opt["hidden_dim"]

    # Relation attention has a single key (Sk=1): softmax == 1, so the pooled
    # attention output == rel_vec @ (Wv@Wo) + (bv@Wo + bo) for any Q.
    a = params["rnn_attn"]
    wvo = a["wv"] @ a["wo"]
    bvo = a["bv"] @ a["wo"] + a["bo"]
    rel_att_table = params["rel_matrix"] @ wvo + bvo            # (num_rel, d_model)

    cls_w_pad = jnp.zeros((mem, ncp), jnp.float32).at[:, :nc].set(params["cls_w"])
    cls_b_pad = jnp.zeros((1, ncp), jnp.float32).at[:, :nc].set(params["cls_b"])

    pieces = [("enc_w", params["elmo_enc_w"]), ("enc_b", params["elmo_enc_b"])]
    for l in range(opt["num_layers"]):
        # fold the factor 2 of (AxW + xW + 2b) into the stored bias
        pieces += [(f"gcn_w{l}", params["gcn_w"][l]),
                   (f"gcn_b{l}", 2.0 * params["gcn_b"][l])]
    for l in range(opt["mlp_layers"]):
        pieces += [(f"mlp_w{l}", params["mlp_w"][l]), (f"mlp_b{l}", params["mlp_b"][l])]
    pieces += [("cls_w", cls_w_pad), ("cls_b", cls_b_pad)]
    slab, offs = _pack_slab(pieces)

    consts = {
        "slab": slab, "rel_att_table": rel_att_table,
        "mesh_emb": params["mesh_emb"], "word_emb": params["word_emb"],
        "pos_emb": params["pos_emb"], "dis_emb": params["dis_emb"],
        "elmo_proj": params["elmo_proj"],
    }
    return consts, offs


# ----------------------------------------------------------------------------
# Forward pass (embedding / adjacency glue outside, all compute in one kernel)
# ----------------------------------------------------------------------------
def gcn_classifier_forward(consts, inputs, adj, opt, offs):
    B, S = inputs["token_id"].shape

    # ---- embeddings (glue) ----
    mesh_embs = consts["mesh_emb"][inputs["all_two_mesh_index"]]          # (B, 2, mesh_dim)
    word_embs = consts["word_emb"][inputs["token_id"]]                    # (B, S, word_dim)
    pos_embedding = consts["pos_emb"][inputs["pos"]]                      # (B, S, pos_dim)
    dis1_embedding = consts["dis_emb"][inputs["dis1"]]
    dis2_embedding = consts["dis_emb"][inputs["dis2"]]
    elmo_embs = word_embs @ consts["elmo_proj"]                           # ELMo stand-in

    # Entity embeddings: reproduce original loop quirk — `break` after i=0, so
    # only batch element 0 receives the mesh vectors at its entity positions.
    subj_first = jnp.argmax(inputs["subj_positions"][0] == 0)
    obj_first = jnp.argmax(inputs["obj_positions"][0] == 0)
    entity_embs = jnp.zeros((B, S, opt["mesh_dim"]), jnp.float32)
    entity_embs = entity_embs.at[0, subj_first].set(mesh_embs[0, 0])
    entity_embs = entity_embs.at[0, obj_first].set(mesh_embs[0, 1])

    elmo_input = jnp.concatenate(
        [elmo_embs, pos_embedding, dis1_embedding, dis2_embedding, entity_embs], axis=2)
    x2d = elmo_input.reshape(B * S, -1)                                   # (B*S, Ein)
    # in_drop / rnn_drop / gcn_drop / mlp_drop are identity in eval mode.
    # NOTE: the BERT branch (bert_rnn_output and its pools) never reaches the
    # returned logits (single-key attention), so it is dropped entirely.

    # ---- normalized block-diagonal adjacency Â = D⁻¹(A+I), pool mask, denom ----
    row_deg = jnp.sum(adj, axis=2)                                        # (B, S)
    col_deg = jnp.sum(adj, axis=1)                                        # (B, S)
    inv_denom = 1.0 / (row_deg + 1.0)                                     # (B, S)
    adj_norm = (adj + jnp.eye(S, dtype=jnp.float32)[None]) * inv_denom[:, :, None]
    a_hat = (adj_norm[:, :, None, :] *
             jnp.eye(B, dtype=jnp.float32)[:, None, :, None]).reshape(B * S, B * S)

    subj_m = (inputs["subj_mask"] != 0).astype(jnp.float32)               # nonzero = masked
    obj_m = (inputs["obj_mask"] != 0).astype(jnp.float32)
    pool_m = ((row_deg + col_deg) == 0.0).astype(jnp.float32)
    masks = jnp.stack([subj_m, obj_m, pool_m], axis=0)                    # (3, B, S)

    # TODO(synk): self.mask() random relation dropout skipped (non-deterministic).
    rel_att = consts["rel_att_table"][inputs["ctd_label"]]                # (B, d_model)

    logits_pad = fused_forward(x2d, a_hat, masks, inv_denom.reshape(B * S, 1),
                               rel_att, consts["slab"], offs, opt)
    return logits_pad[:, :opt["num_class"]]


# ----------------------------------------------------------------------------
# Example run
# ----------------------------------------------------------------------------
if __name__ == "__main__":
    opt = dict(
        rnn_hidden=32, heads=4, d_k=16, hidden_dim=32, num_layers=2,
        mlp_layers=2, num_class=5,
        pos_dim=8, dis_dim=8, dis_range=5, pos_size=10,
        mesh_size=10, mesh_dim=16, word_size=50, word_dim=32,
        elmo_dim=48, bert_dim=48,
        num_rel=6, rel_dim=128,
    )
    B, S = 2, 8

    key = jax.random.PRNGKey(0)
    pkey, ikey = jax.random.split(key)
    params = init_params(pkey, opt)
    consts, offs = build_fused(params, opt)

    ks = iter(jax.random.split(ikey, 16))
    token_id = jax.random.randint(next(ks), (B, S), 0, opt["word_size"], jnp.int32)
    pos = jax.random.randint(next(ks), (B, S), 0, opt["pos_size"], jnp.int32)
    dis1 = jax.random.randint(next(ks), (B, S), 0, 2 * opt["dis_range"] + 1, jnp.int32)
    dis2 = jax.random.randint(next(ks), (B, S), 0, 2 * opt["dis_range"] + 1, jnp.int32)
    all_two_mesh_index = jax.random.randint(next(ks), (B, 2), 0, opt["mesh_size"], jnp.int32)
    ctd_label = jax.random.randint(next(ks), (B,), 0, opt["num_rel"], jnp.int32)
    head = jax.random.randint(next(ks), (B, S), 0, S + 1, jnp.int32)  # 0 = root

    # subject / object masks: 0 at entity positions, nonzero elsewhere
    subj_mask = np.ones((B, S), np.int32); subj_mask[:, 1] = 0
    obj_mask = np.ones((B, S), np.int32); obj_mask[:, 4] = 0
    subj_positions = subj_mask.copy()
    obj_positions = obj_mask.copy()

    # TODO(synk): head_to_tree / tree_to_adj pruning replaced with direct
    # undirected head->child adjacency (no self-loops), built host-side.
    head_np = np.array(head)
    adj_np = np.zeros((B, S, S), np.float32)
    for b in range(B):
        for i in range(S):
            h = int(head_np[b, i])
            if h > 0:
                adj_np[b, i, h - 1] = 1.0
                adj_np[b, h - 1, i] = 1.0

    inputs = dict(
        token_id=token_id, pos=pos, dis1=dis1, dis2=dis2,
        all_two_mesh_index=all_two_mesh_index, ctd_label=ctd_label,
        subj_mask=jnp.asarray(subj_mask), obj_mask=jnp.asarray(obj_mask),
        subj_positions=jnp.asarray(subj_positions), obj_positions=jnp.asarray(obj_positions),
    )
    adj = jnp.asarray(adj_np)

    forward = jax.jit(lambda c, i, a: gcn_classifier_forward(c, i, a, opt, offs))
    logits = forward(consts, inputs, adj)
    logits = jax.block_until_ready(logits)
    assert logits.shape == (B, opt["num_class"])
    assert bool(jnp.all(jnp.isfinite(logits)))
    print("KERNEL_OK")
</pallas_src>

<mosaic_0001>
module attributes {stable_mosaic.version = 11 : i64} {
  func.func @_fused_kernel(%arg0: memref<16x88xf32, #tpu.memory_space<vmem>>, %arg1: memref<16x16xf32, #tpu.memory_space<vmem>>, %arg2: memref<3x2x8xf32, #tpu.memory_space<vmem>>, %arg3: memref<16x1xf32, #tpu.memory_space<vmem>>, %arg4: memref<2x64xf32, #tpu.memory_space<vmem>>, %arg5: memref<456x128xf32, #tpu.memory_space<vmem>>, %arg6: memref<2x128xf32, #tpu.memory_space<vmem>>) attributes {dimension_semantics = [], scalar_prefetch = 0 : i64, scratch_operands = 0 : i64, tpu.core_type = #tpu.core_type<tc>} {
    %c0 = arith.constant 0 : index
    %c0_0 = arith.constant 0 : index
    %0 = vector.load %arg0[%c0, %c0_0] : memref<16x88xf32, #tpu.memory_space<vmem>>, vector<16x88xf32>
    %c0_1 = arith.constant 0 : index
    %c0_2 = arith.constant 0 : index
    %1 = vector.load %arg5[%c0_1, %c0_2] : memref<456x128xf32, #tpu.memory_space<vmem>>, vector<88x64xf32>
    %cst = arith.constant dense<0.000000e+00> : vector<16x64xf32>
    %2 = tpu.matmul %0, %1, %cst {dimension_numbers = #tpu.dot_dimension_numbers<[1], [0], [0], [1], [0, 0, 1, 1], [], []>} : vector<16x88xf32>, vector<88x64xf32>, vector<16x64xf32> -> vector<16x64xf32>
    %c88 = arith.constant 88 : index
    %c0_3 = arith.constant 0 : index
    %3 = vector.load %arg5[%c88, %c0_3] : memref<456x128xf32, #tpu.memory_space<vmem>>, vector<1x64xf32>
    %4 = vector.broadcast %3 : vector<1x64xf32> to vector<16x64xf32>
    %5 = arith.addf %2, %4 : vector<16x64xf32>
    %6 = math.tanh %5 : vector<16x64xf32>
    %c0_4 = arith.constant 0 : index
    %c0_5 = arith.constant 0 : index
    %7 = vector.load %arg1[%c0_4, %c0_5] : memref<16x16xf32, #tpu.memory_space<vmem>>, vector<16x16xf32>
    %c0_6 = arith.constant 0 : index
    %c0_7 = arith.constant 0 : index
    %8 = vector.load %arg3[%c0_6, %c0_7] : memref<16x1xf32, #tpu.memory_space<vmem>>, vector<16x1xf32>
    %cst_8 = arith.constant dense<0.000000e+00> : vector<16x64xf32>
    %9 = tpu.matmul %7, %6, %cst_8 {dimension_numbers = #tpu.dot_dimension_numbers<[1], [0], [0], [1], [0, 0, 1, 1], [], []>} : vector<16x16xf32>, vector<16x64xf32>, vector<16x64xf32> -> vector<16x64xf32>
    %c96 = arith.constant 96 : index
    %c0_9 = arith.constant 0 : index
    %10 = vector.load %arg5[%c96, %c0_9] : memref<456x128xf32, #tpu.memory_space<vmem>>, vector<64x32xf32>
    %cst_10 = arith.constant dense<0.000000e+00> : vector<16x32xf32>
    %11 = tpu.matmul %9, %10, %cst_10 {dimension_numbers = #tpu.dot_dimension_numbers<[1], [0], [0], [1], [0, 0, 1, 1], [], []>} : vector<16x64xf32>, vector<64x32xf32>, vector<16x32xf32> -> vector<16x32xf32>
    %c160 = arith.constant 160 : index
    %c0_11 = arith.constant 0 : index
    %12 = vector.load %arg5[%c160, %c0_11] : memref<456x128xf32, #tpu.memory_space<vmem>>, vector<1x32xf32>
    %13 = vector.broadcast %12 : vector<1x32xf32> to vector<16x32xf32>
    %14 = vector.broadcast %8 : vector<16x1xf32> to vector<16x32xf32>
    %15 = arith.mulf %13, %14 : vector<16x32xf32>
    %16 = arith.addf %11, %15 : vector<16x32xf32>
    %cst_12 = arith.constant 0.000000e+00 : f32
    %17 = vector.broadcast %cst_12 : f32 to vector<16x32xf32>
    %18 = arith.maximumf %16, %17 : vector<16x32xf32>
    %cst_13 = arith.constant dense<0.000000e+00> : vector<16x32xf32>
    %19 = tpu.matmul %7, %18, %cst_13 {dimension_numbers = #tpu.dot_dimension_numbers<[1], [0], [0], [1], [0, 0, 1, 1], [], []>} : vector<16x16xf32>, vector<16x32xf32>, vector<16x32xf32> -> vector<16x32xf32>
    %c168 = arith.constant 168 : index
    %c0_14 = arith.constant 0 : index
    %20 = vector.load %arg5[%c168, %c0_14] : memref<456x128xf32, #tpu.memory_space<vmem>>, vector<32x32xf32>
    %cst_15 = arith.constant dense<0.000000e+00> : vector<16x32xf32>
    %21 = tpu.matmul %19, %20, %cst_15 {dimension_numbers = #tpu.dot_dimension_numbers<[1], [0], [0], [1], [0, 0, 1, 1], [], []>} : vector<16x32xf32>, vector<32x32xf32>, vector<16x32xf32> -> vector<16x32xf32>
    %c200 = arith.constant 200 : index
    %c0_16 = arith.constant 0 : index
    %22 = vector.load %arg5[%c200, %c0_16] : memref<456x128xf32, #tpu.memory_space<vmem>>, vector<1x32xf32>
    %23 = vector.broadcast %22 : vector<1x32xf32> to vector<16x32xf32>
    %24 = vector.broadcast %8 : vector<16x1xf32> to vector<16x32xf32>
    %25 = arith.mulf %23, %24 : vector<16x32xf32>
    %26 = arith.addf %21, %25 : vector<16x32xf32>
    %cst_17 = arith.constant 0.000000e+00 : f32
    %27 = vector.broadcast %cst_17 : f32 to vector<16x32xf32>
    %28 = arith.maximumf %26, %27 : vector<16x32xf32>
    %29 = vector.shape_cast %28 : vector<16x32xf32> to vector<2x8x32xf32>
    %c0_18 = arith.constant 0 : index
    %c0_19 = arith.constant 0 : index
    %c0_20 = arith.constant 0 : index
    %30 = vector.load %arg2[%c0_18, %c0_19, %c0_20] : memref<3x2x8xf32, #tpu.memory_space<vmem>>, vector<1x2x8xf32>
    %31 = vector.shape_cast %30 : vector<1x2x8xf32> to vector<2x8xf32>
    %32 = vector.shape_cast %31 : vector<2x8xf32> to vector<2x8x1xf32>
    %cst_21 = arith.constant 0.000000e+00 : f32
    %33 = vector.broadcast %cst_21 : f32 to vector<2x8x1xf32>
    %34 = arith.cmpf one, %32, %33 : vector<2x8x1xf32>
    %cst_22 = arith.constant -9.99999995E+11 : f32
    %35 = vector.shape_cast %34 : vector<2x8x1xi1> to vector<2x8x1xi1>
    %36 = vector.broadcast %35 : vector<2x8x1xi1> to vector<2x8x32xi1>
    %37 = vector.broadcast %cst_22 : f32 to vector<2x8x32xf32>
    %38 = arith.select %36, %37, %29 : vector<2x8x32xi1>, vector<2x8x32xf32>
    %cst_23 = arith.constant dense<0xFF800000> : vector<2x32xf32>
    %39 = vector.multi_reduction <maximumf>, %38, %cst_23 [1] : vector<2x8x32xf32> to vector<2x32xf32>
    %c1 = arith.constant 1 : index
    %c0_24 = arith.constant 0 : index
    %c0_25 = arith.constant 0 : index
    %40 = vector.load %arg2[%c1, %c0_24, %c0_25] : memref<3x2x8xf32, #tpu.memory_space<vmem>>, vector<1x2x8xf32>
    %41 = vector.shape_cast %40 : vector<1x2x8xf32> to vector<2x8xf32>
    %42 = vector.shape_cast %41 : vector<2x8xf32> to vector<2x8x1xf32>
    %cst_26 = arith.constant 0.000000e+00 : f32
    %43 = vector.broadcast %cst_26 : f32 to vector<2x8x1xf32>
    %44 = arith.cmpf one, %42, %43 : vector<2x8x1xf32>
    %cst_27 = arith.constant -9.99999995E+11 : f32
    %45 = vector.shape_cast %44 : vector<2x8x1xi1> to vector<2x8x1xi1>
    %46 = vector.broadcast %45 : vector<2x8x1xi1> to vector<2x8x32xi1>
    %47 = vector.broadcast %cst_27 : f32 to vector<2x8x32xf32>
    %48 = arith.select %46, %47, %29 : vector<2x8x32xi1>, vector<2x8x32xf32>
    %cst_28 = arith.constant dense<0xFF800000> : vector<2x32xf32>
    %49 = vector.multi_reduction <maximumf>, %48, %cst_28 [1] : vector<2x8x32xf32> to vector<2x32xf32>
    %c2 = arith.constant 2 : index
    %c0_29 = arith.constant 0 : index
    %c0_30 = arith.constant 0 : index
    %50 = vector.load %arg2[%c2, %c0_29, %c0_30] : memref<3x2x8xf32, #tpu.memory_space<vmem>>, vector<1x2x8xf32>
    %51 = vector.shape_cast %50 : vector<1x2x8xf32> to vector<2x8xf32>
    %52 = vector.shape_cast %51 : vector<2x8xf32> to vector<2x8x1xf32>
    %cst_31 = arith.constant 0.000000e+00 : f32
    %53 = vector.broadcast %cst_31 : f32 to vector<2x8x1xf32>
    %54 = arith.cmpf one, %52, %53 : vector<2x8x1xf32>
    %cst_32 = arith.constant -9.99999995E+11 : f32
    %55 = vector.shape_cast %54 : vector<2x8x1xi1> to vector<2x8x1xi1>
    %56 = vector.broadcast %55 : vector<2x8x1xi1> to vector<2x8x32xi1>
    %57 = vector.broadcast %cst_32 : f32 to vector<2x8x32xf32>
    %58 = arith.select %56, %57, %29 : vector<2x8x32xi1>, vector<2x8x32xf32>
    %cst_33 = arith.constant dense<0xFF800000> : vector<2x32xf32>
    %59 = vector.multi_reduction <maximumf>, %58, %cst_33 [1] : vector<2x8x32xf32> to vector<2x32xf32>
    %c0_34 = arith.constant 0 : index
    %c0_35 = arith.constant 0 : index
    %60 = vector.load %arg4[%c0_34, %c0_35] : memref<2x64xf32, #tpu.memory_space<vmem>>, vector<2x64xf32>
    %c208 = arith.constant 208 : index
    %c0_36 = arith.constant 0 : index
    %61 = vector.load %arg5[%c208, %c0_36] : memref<456x128xf32, #tpu.memory_space<vmem>>, vector<64x32xf32>
    %cst_37 = arith.constant dense<0.000000e+00> : vector<2x32xf32>
    %62 = tpu.matmul %60, %61, %cst_37 {dimension_numbers = #tpu.dot_dimension_numbers<[1], [0], [0], [1], [0, 0, 1, 1], [], []>} : vector<2x64xf32>, vector<64x32xf32>, vector<2x32xf32> -> vector<2x32xf32>
    %c272 = arith.constant 272 : index
    %c0_38 = arith.constant 0 : index
    %63 = vector.load %arg5[%c272, %c0_38] : memref<456x128xf32, #tpu.memory_space<vmem>>, vector<32x32xf32>
    %cst_39 = arith.constant dense<0.000000e+00> : vector<2x32xf32>
    %64 = tpu.matmul %39, %63, %cst_39 {dimension_numbers = #tpu.dot_dimension_numbers<[1], [0], [0], [1], [0, 0, 1, 1], [], []>} : vector<2x32xf32>, vector<32x32xf32>, vector<2x32xf32> -> vector<2x32xf32>
    %65 = arith.addf %62, %64 : vector<2x32xf32>
    %c304 = arith.constant 304 : index
    %c0_40 = arith.constant 0 : index
    %66 = vector.load %arg5[%c304, %c0_40] : memref<456x128xf32, #tpu.memory_space<vmem>>, vector<32x32xf32>
    %cst_41 = arith.constant dense<0.000000e+00> : vector<2x32xf32>
    %67 = tpu.matmul %49, %66, %cst_41 {dimension_numbers = #tpu.dot_dimension_numbers<[1], [0], [0], [1], [0, 0, 1, 1], [], []>} : vector<2x32xf32>, vector<32x32xf32>, vector<2x32xf32> -> vector<2x32xf32>
    %68 = arith.addf %65, %67 : vector<2x32xf32>
    %c336 = arith.constant 336 : index
    %c0_42 = arith.constant 0 : index
    %69 = vector.load %arg5[%c336, %c0_42] : memref<456x128xf32, #tpu.memory_space<vmem>>, vector<32x32xf32>
    %cst_43 = arith.constant dense<0.000000e+00> : vector<2x32xf32>
    %70 = tpu.matmul %59, %69, %cst_43 {dimension_numbers = #tpu.dot_dimension_numbers<[1], [0], [0], [1], [0, 0, 1, 1], [], []>} : vector<2x32xf32>, vector<32x32xf32>, vector<2x32xf32> -> vector<2x32xf32>
    %71 = arith.addf %68, %70 : vector<2x32xf32>
    %c368 = arith.constant 368 : index
    %c0_44 = arith.constant 0 : index
    %72 = vector.load %arg5[%c368, %c0_44] : memref<456x128xf32, #tpu.memory_space<vmem>>, vector<1x32xf32>
    %73 = vector.broadcast %72 : vector<1x32xf32> to vector<2x32xf32>
    %74 = arith.addf %71, %73 : vector<2x32xf32>
    %cst_45 = arith.constant 0.000000e+00 : f32
    %75 = vector.broadcast %cst_45 : f32 to vector<2x32xf32>
    %76 = arith.maximumf %74, %75 : vector<2x32xf32>
    %c376 = arith.constant 376 : index
    %c0_46 = arith.constant 0 : index
    %77 = vector.load %arg5[%c376, %c0_46] : memref<456x128xf32, #tpu.memory_space<vmem>>, vector<32x32xf32>
    %cst_47 = arith.constant dense<0.000000e+00> : vector<2x32xf32>
    %78 = tpu.matmul %76, %77, %cst_47 {dimension_numbers = #tpu.dot_dimension_numbers<[1], [0], [0], [1], [0, 0, 1, 1], [], []>} : vector<2x32xf32>, vector<32x32xf32>, vector<2x32xf32> -> vector<2x32xf32>
    %c408 = arith.constant 408 : index
    %c0_48 = arith.constant 0 : index
    %79 = vector.load %arg5[%c408, %c0_48] : memref<456x128xf32, #tpu.memory_space<vmem>>, vector<1x32xf32>
    %80 = vector.broadcast %79 : vector<1x32xf32> to vector<2x32xf32>
    %81 = arith.addf %78, %80 : vector<2x32xf32>
    %cst_49 = arith.constant 0.000000e+00 : f32
    %82 = vector.broadcast %cst_49 : f32 to vector<2x32xf32>
    %83 = arith.maximumf %81, %82 : vector<2x32xf32>
    %c416 = arith.constant 416 : index
    %c0_50 = arith.constant 0 : index
    %84 = vector.load %arg5[%c416, %c0_50] : memref<456x128xf32, #tpu.memory_space<vmem>>, vector<32x128xf32>
    %cst_51 = arith.constant dense<0.000000e+00> : vector<2x128xf32>
    %85 = tpu.matmul %83, %84, %cst_51 {dimension_numbers = #tpu.dot_dimension_numbers<[1], [0], [0], [1], [0, 0, 1, 1], [], []>} : vector<2x32xf32>, vector<32x128xf32>, vector<2x128xf32> -> vector<2x128xf32>
    %c448 = arith.constant 448 : index
    %c0_52 = arith.constant 0 : index
    %86 = vector.load %arg5[%c448, %c0_52] : memref<456x128xf32, #tpu.memory_space<vmem>>, vector<1x128xf32>
    %87 = vector.broadcast %86 : vector<1x128xf32> to vector<2x128xf32>
    %88 = arith.addf %85, %87 : vector<2x128xf32>
    %c0_53 = arith.constant 0 : index
    %c0_54 = arith.constant 0 : index
    %89 = vector.load %arg6[%c0_53, %c0_54] : memref<2x128xf32, #tpu.memory_space<vmem>>, vector<2x128xf32>
    tpu.vector_store %arg6[%c0_53, %c0_54], %88 {strides = array<i32>} : memref<2x128xf32, #tpu.memory_space<vmem>>, vector<2x128xf32>,
    return
  }
}

</mosaic_0001>

<bundles_post_ra>
// kernel: _lambda_.1
= control target key start
LH: loop header
LB: loop body
LE: loop exit
PB: predicated region body
PF: predicated region fallthrough
CT: control target
= control target key end

     0   :  { %vm42_vm0 = vcmask 719872   ;;  %s1791_s0 = inlined_call_operand.vmem [shape: f32[16,88], index: 0, kind: input, shape index: {}]   ;;  %s1792_s1 = inlined_call_operand.vmem [shape: f32[16,16], index: 1, kind: input, shape index: {}]   ;;  %s1793_s2 = inlined_call_operand.vmem [shape: f32[3,2,8], index: 2, kind: input, shape index: {}]   ;;  %s1794_s3 = inlined_call_operand.vmem [shape: f32[16,1], index: 3, kind: input, shape index: {}]   ;;  %s1795_s4 = inlined_call_operand.vmem [shape: f32[2,64], index: 4, kind: input, shape index: {}]   ;;  %s1796_s5 = inlined_call_operand.vmem [shape: f32[456,128], index: 5, kind: input, shape index: {}]   ;;  %s1797_s6 = inlined_call_operand.hbm [shape: f32[2,128], index: 6, kind: output, shape index: {}]  }
   0x1   :  { %v26_v0 = vld [vmem:[%s1796_s5] sm:$0xff]  ;;  %v27_v1 = vld [vmem:[%s1796_s5 + $0x8] sm:$0xff]  ;;  %v28_v2 = vld [vmem:[%s1796_s5 + $0x10] sm:$0xff] }
   0x2   :  { %v1351_v3 = vpack.c.bf16 %v27_v1, %v26_v0  ;;  %v29_v4 = vld [vmem:[%s1796_s5 + $0x18] sm:$0xff]  ;;  %v30_v6 = vld [vmem:[%s1796_s5 + $0x20] sm:$0xff]  ;;  %v31_v7 = vld [vmem:[%s1796_s5 + $0x28] sm:$0xff] }
   0x3   :  { %v1355_v5 = vpack.c.bf16 %v29_v4, %v28_v2  ;;  %v24_v8 = vld [vmem:[%s1791_s0] sm:$0xff] }
   0x4   :  { %1352 = vmatprep.subr.bf16.mxu0 %v1351_v3  ;;  %1230 = vmatprep.mubr.msk.f32.mxu0 %vm42_vm0, %v24_v8 }
   0x5   :  { %1354 = vmatpush3.bf16.msra.mxu0 %v1351_v3 }
   0x6   :  { %11 = vsyncpa [#allocation3], 0  ;;  %1356 = vmatprep.subr.bf16.mxu0 %v1355_v5  ;;  %v1359_v9 = vpack.c.bf16 %v31_v7, %v30_v6  ;;  %v32_v10 = vld [vmem:[%s1796_s5 + $0x30] sm:$0xff]  ;;  %v33_v11 = vld [vmem:[%s1796_s5 + $0x38] sm:$0xff]  ;;  %vm130_vm1 = vcmask 130048   ;;  %v1479_v41 = vmov 0   ;;  %v492_v63 = vlaneseq }
   0x7   :  { %v1363_v12 = vpack.c.bf16 %v33_v11, %v32_v10  ;;  %v34_v13 = vld [vmem:[%s1796_s5 + $0x40] sm:$0xff]  ;;  %v35_v14 = vld [vmem:[%s1796_s5 + $0x48] sm:$0xff]  ;;  %v36_v16 = vld [vmem:[%s1796_s5 + $0x50] sm:$0xff]  ;;  %1450 = vset.pattern.permute.xlu0 %v1479_v41  ;;  %vm237_vm2 = vcmask 523264   ;;  %vm407_vm3 = vcmask 261120   ;;  %vm1481_vm4 = vmmov 0  }
   0x8   :  { %v1367_v15 = vpack.c.bf16 %v35_v14, %v34_v13  ;;  %v25_v17 = vld [vmem:[%s1791_s0 + $0x8] sm:$0xff]  ;;  %v126_v18 = vld [vmem:[%s1792_s1] sm:$0xff]  ;;  %v1113_v19 = vld [vmem:[%s1796_s5 + $0x58] ss:$0 sm:$0xff]  ;;  %v493_v0 = vshrl.u32 %v492_v63, 7  ;;  %vm619_vm11 = vcmask 1041409  }
   0x9   :  { %1358 = vmatpush3.bf16.msra.mxu0 %v1355_v5  ;;  %1237 = vmatprep.mubr.msk.f32.mxu1 %vm130_vm1, %v126_v18  ;;  %v212_v24 = vld [vmem:[%s1796_s5 + $0x60] sm:$0xff]  ;;  %v213_v25 = vld [vmem:[%s1796_s5 + $0x68] sm:$0xff]  ;;  %v214_v30 = vld [vmem:[%s1796_s5 + $0x70] sm:$0xff]  ;;  %s1483_s19 = smov [#allocation2]  }
   0xa   :  { %1360 = vmatprep.subr.bf16.mxu0 %v1359_v9  ;;  %v1375_v29 = vpack.c.bf16 %v213_v25, %v212_v24  ;;  %v215_v31 = vld [vmem:[%s1796_s5 + $0x78] sm:$0xff]  ;;  %v127_v32 = vld [vmem:[%s1792_s1 + $0x8] sm:$0xff]  ;;  %v216_v34 = vld [vmem:[%s1796_s5 + $0x80] sm:$0xff]  ;;  %v494_v3 = vsub.s32 0, %v493_v0  ;;  %v501_v4 = vsub.s32 1, %v493_v0  ;;  %s1105_s20 = sshll.u32 %s1483_s19, 4  ;;  %s1106_s20 = int_to_ptr.vmem [resolvable:$true] %s1105_s20 }
   0xb   :  { %v1379_v33 = vpack.c.bf16 %v215_v31, %v214_v30  ;;  %v217_v35 = vld [vmem:[%s1796_s5 + $0x88] sm:$0xff]  ;;  %v218_v37 = vld [vmem:[%s1796_s5 + $0x90] sm:$0xff]  ;;  %v219_v38 = vld [vmem:[%s1796_s5 + $0x98] sm:$0xff]  ;;  %s1455_s21 = scalar_lea.vmem %s1106_s20, 32  ;;  %p1460_p1 = scmp.lt.s32.totalorder %s1106_s20, %s1106_s20 }
   0xc   :  { %v1383_v36 = vpack.c.bf16 %v217_v35, %v216_v34  ;;  %v1387_v39 = vpack.c.bf16 %v219_v38, %v218_v37  ;;  %v128_v40 = vld [vmem:[%s1794_s3] sm:$0xff]  ;;  %v129_v42 = vld [vmem:[%s1794_s3 + $0x8] sm:$0xff]  ;;  %v397_v46 = vld [vmem:[%s1796_s5 + $0xb0] sm:$0xff]  ;;  %p1456_p0 = scmp.ne.s32.totalorder %s1106_s20, %s1455_s21  ;;  %p1461_p2 = scmp.lt.s32.totalorder %s1455_s21, %s1455_s21 }
   0xd   :  { %1362 = vmatpush3.bf16.msra.mxu0 %v1359_v9  ;;  %227 = vperm.xlu0 %1450, %v128_v40   ;;  %v396_v45 = vld [vmem:[%s1796_s5 + $0xa8] sm:$0xff]  ;;  %v398_v47 = vld [vmem:[%s1796_s5 + $0xb8] sm:$0xff]  ;;  %v399_v49 = vld [vmem:[%s1796_s5 + $0xc0] sm:$0xff] }
   0xe   :  { %1364 = vmatprep.subr.bf16.mxu0 %v1363_v12  ;;  %v1395_v48 = vpack.c.bf16 %v397_v46, %v396_v45  ;;  %v1399_v50 = vpack.c.bf16 %v399_v49, %v398_v47  ;;  %v1118_v52 = vld [vmem:[%s1796_s5 + $0xa0] ss:$0 sm:$0xff]  ;;  %v1126_v2 = vld [vmem:[%s1793_s2 + $0x2] sm:$0x3]  ;;  %v1127_v5 = vld [vmem:[%s1793_s2 + $0x4] sm:$0x3]  ;;  %p1462_p3 = por %p1461_p2, %p1460_p1 }
   0xf   :  { %v491_v1 = vld [vmem:[%s1793_s2] sm:$0x3]  ;;  %v533_v7 = vrot.slane %v1126_v2, %v494_v3  ;;  %v571_v9 = vrot.slane %v1127_v5, %v494_v3  ;;  %v540_v10 = vrot.slane %v1126_v2, %v501_v4  ;;  %v578_v11 = vrot.slane %v1127_v5, %v501_v4  ;;  %v605_v14 = vld [vmem:[%s1796_s5 + $0xd0] sm:$0xff]  ;;  %v610_v25 = vld [vmem:[%s1796_s5 + $0xf8] sm:$0xff] }
  0x10   :  { %v495_v6 = vrot.slane %v491_v1, %v494_v3  ;;  %v502_v8 = vrot.slane %v491_v1, %v501_v4  ;;  %v609_v24 = vld [vmem:[%s1796_s5 + $0xf0] sm:$0xff]  ;;  %v611_v30 = vld [vmem:[%s1796_s5 + $0x100] sm:$0xff]  ;;  %v612_v31 = vld [vmem:[%s1796_s5 + $0x108] sm:$0xff]  ;;  %p1463_p4 = pnand %p1462_p3, %p1456_p0 }
  0x11   :  { %1366 = vmatpush3.bf16.msra.mxu0 %v1363_v12  ;;  %232 = vperm.xlu0 %1450, %v129_v42   ;;  %v604_v34 = vld [vmem:[%s1795_s4] sm:$0x3] }
  0x12   :  { %1368 = vmatprep.subr.bf16.mxu0 %v1367_v15  ;;  %497 = vbcast.lane.b32.xlu1 %v495_v6, 256 }
  0x15   :  { %1370 = vmatpush3.bf16.msra.mxu0 %v1367_v15  ;;  %535 = vbcast.lane.b32.xlu0 %v533_v7, 256  ;;  %v606_v15 = vld [vmem:[%s1796_s5 + $0xd8] sm:$0xff] }
  0x16   :  { %1228 = vmatprep.subr.mxu0 %v36_v16  ;;  %504 = vbcast.lane.b32.xlu1 %v502_v8, 256 }
  0x19   :  { %1229 = vmatpush3.msra.mxu0 %v36_v16  ;;  %573 = vbcast.lane.b32.xlu0 %v571_v9, 256  ;;  %v1410_v16 = vpack.c.bf16 %v606_v15, %v605_v14 }
  0x1a   :  { %1231 = vmatmul.mubr.msk.f32.vlgmr.msra.gmra.mrb[0].mxu0 %vm42_vm0, %v25_v17  ;;  %1396 = vmatprep.subr.bf16.mxu0 %v1395_v48  ;;  %v1480_v17 = vmov 0.0|0.0  }
  0x1b   :  { %1398 = vmatpush3.bf16.msra.mxu0 %v1395_v48  ;;  %542 = vbcast.lane.b32.xlu1 %v540_v10, 256 }
  0x1c   :  { %1400 = vmatprep.subr.bf16.mxu0 %v1399_v50 }
  0x1f   :  { %1402 = vmatpush3.bf16.msra.mxu0 %v1399_v50  ;;  %580 = vbcast.lane.b32.xlu1 %v578_v11, 256 }
  0x20   :  { %1409 = vmatprep.subr.bf16.mxu0 %v1480_v17 }
  0x84   :  { %v498_v35 = vpop.permute.xlu1 %497 }
  0x85   :  { %vm506_vm9 = vcmp.ne.f32.partialorder %v498_v35, 0.0 }
  0x8c   :  { %v1616_v51 = vpop.permute.xlu0 %227 }
  0x8d   :  { %v235_v55 = vmul.f32 %v1118_v52, %v1616_v51 }
  0x90   :  { %v1621_v53 = vpop.permute.xlu0 %232 }
  0x91   :  { %v236_v54 = vmul.f32 %v1118_v52, %v1621_v53 }
  0x94   :  { %v536_v38 = vpop.permute.xlu0 %535 }
  0x95   :  { %vm544_vm8 = vcmp.ne.f32.partialorder %v536_v38, 0.0  ;;  %v768_v38 = vld [vmem:[%s1796_s5 + $0x140] sm:$0xff] }
  0x98   :  { %v574_v46 = vpop.permute.xlu0 %573 }
  0x99   :  { %vm582_vm10 = vcmp.ne.f32.partialorder %v574_v46, 0.0  ;;  %v847_v46 = vld [vmem:[%s1796_s5 + $0x158] sm:$0xff] }
  0xed   :  { %v1232_v20 = vpop.f32.mrb[0].mxu0 }
  0xee   :  { %v121_v21 = vadd.f32 %v1232_v20, %v1113_v19  ;;  %v115_v22 = vpop.f32.mrb[1].mxu0 }
  0xef   :  { %v116_v23 = vadd.f32 %v1113_v19, %v115_v22  ;;  %v608_v19 = vld [vmem:[%s1796_s5 + $0xe8] sm:$0xff]  ;;  %v614_v22 = vld [vmem:[%s1796_s5 + $0x118] sm:$0xff] }
  0xf0   :  { %1451 = vtanh.f32 %v121_v21  ;;  %v613_v21 = vld [vmem:[%s1796_s5 + $0x110] sm:$0xff] }
  0xf1   :  { %1453 = vtanh.f32 %v116_v23  ;;  %v1404_v23 = vpack.c.bf16 %v614_v22, %v613_v21 }
  0xfa   :  { %v1452_v26 = vpop.eup %1451 }
  0xfb   :  { %v1454_v27 = vpop.eup %1453 }
  0xfc   :  { %v1371_v28 = vpack.c.bf16 %v1452_v26, %v1454_v27  ;;  %v1416_v26 = vpack.c.bf16 %v610_v25, %v609_v24  ;;  %v615_v27 = vld [vmem:[%s1796_s5 + $0x120] sm:$0xff]  ;;  %v766_v24 = vld [vmem:[%s1796_s5 + $0x130] sm:$0xff]  ;;  %v767_v25 = vld [vmem:[%s1796_s5 + $0x138] sm:$0xff] }
  0xfd   :  { %v1422_v35 = vpack.c.bf16 %v767_v25, %v766_v24 }
  0xfe   :  { %1372 = vmatprep.subr.bf16.mxu1 %v1371_v28 }
  0xff   :  { %1374 = vmatpush3.bf16.msra.mxu1 %v1371_v28  ;;  %v616_v28 = vld [vmem:[%s1796_s5 + $0x128] sm:$0xff] }
 0x100   :  { %1376 = vmatprep.subr.bf16.mxu1 %v1375_v29 }
 0x102   :  { %1238 = vmatmul.mubr.msk.f32.vlgmr.msra.gmra.mrb[0].mxu1 %vm130_vm1, %v127_v32 }
 0x103   :  { %1378 = vmatpush3.bf16.msra.mxu1 %v1375_v29  ;;  %v1407_v29 = vpack.c.bf16 %v616_v28, %v615_v27 }
 0x104   :  { %1380 = vmatprep.subr.bf16.mxu1 %v1379_v33 }
 0x107   :  { %1382 = vmatpush3.bf16.msra.mxu1 %v1379_v33  ;;  %v1482_v33 = vmov 0.0  }
 0x108   :  { %1384 = vmatprep.subr.bf16.mxu1 %v1383_v36 }
 0x10b   :  { %1386 = vmatpush3.bf16.msra.mxu1 %v1383_v36  ;;  %v505_v36 = vpop.permute.xlu1 %504 }
 0x10c   :  { %1388 = vmatprep.subr.bf16.mxu1 %v1387_v39  ;;  %vm507_vm5 = vcmp.ne.f32.partialorder %v505_v36, 0.0 }
 0x10f   :  { %1390 = vmatpush3.bf16.msra.mxu1 %v1387_v39  ;;  %v543_v37 = vpop.permute.xlu1 %542  ;;  %v1123_v39 = vld [vmem:[%s1796_s5 + $0xc8] ss:$0 sm:$0xff] }
 0x110   :  { %v406_v40 = vmul.f32 %v1123_v39, %v1621_v53  ;;  %v405_v42 = vmul.f32 %v1123_v39, %v1616_v51  ;;  %vm545_vm6 = vcmp.ne.f32.partialorder %v543_v37, 0.0  ;;  %v769_v39 = vld [vmem:[%s1796_s5 + $0x148] sm:$0xff] }
 0x113   :  { %v581_v41 = vpop.permute.xlu1 %580 }
 0x114   :  { %vm583_vm7 = vcmp.ne.f32.partialorder %v581_v41, 0.0 }
 0x1d5   :  { %v1239_v43 = vpop.f32.mrb[0].mxu1 }
 0x1d6   :  { %v203_v44 = vpop.f32.mrb[1].mxu1 }
 0x1d7   :  { %1256 = vmatprep.mubr.msk.f32.mxu1 %vm237_vm2, %v203_v44 }
 0x1d8   :  { %1257 = vmatmul.mubr.msk.f32.vlgmr.msra.gmra.mrb[2].mxu1 %vm237_vm2, %v1239_v43 }
 0x1d9   :  { %1263 = vmatprep.mubr.msk.f32.mxu1 %vm130_vm1, %v126_v18  ;;  %v607_v18 = vld [vmem:[%s1796_s5 + $0xe0] sm:$0xff] }
 0x1da   :  { %v1413_v20 = vpack.c.bf16 %v608_v19, %v607_v18 }
 0x2ab   :  { %v1258_v56 = vpop.f32.mrb[2].mxu1 }
 0x2ac   :  { %v316_v57 = vadd.f32 %v1258_v56, %v236_v54  ;;  %v310_v58 = vpop.f32.mrb[3].mxu1 }
 0x2ad   :  { %v311_v59 = vadd.f32 %v310_v58, %v235_v55 }
 0x2ae   :  { %v320_v60 = vmax.f32 %v316_v57, 0.0 }
 0x2af   :  { %v319_v61 = vmax.f32 %v311_v59, 0.0 }
 0x2b1   :  { %v1391_v62 = vpack.c.bf16 %v320_v60, %v319_v61 }
 0x2b3   :  { %1392 = vmatprep.subr.bf16.mxu1 %v1391_v62 }
 0x2b4   :  { %1394 = vmatpush3.bf16.msra.mxu1 %v1391_v62 }
 0x2b5   :  { %1403 = vmatprep.subr.bf16.mxu1 %v1480_v17 }
 0x2b7   :  { %1264 = vmatmul.mubr.msk.f32.vlgmr.msra.gmra.mrb[4].mxu1 %vm130_vm1, %v127_v32  ;;  %v1419_v32 = vpack.c.bf16 %v612_v31, %v611_v30 }
 0x2b8   :  { %1405 = vmatpush3.bf16.msra.mxu1 %v1404_v23  ;;  %1285 = vmatprep.mubr.msk.f32.mxu1 %vm1481_vm4, %v1482_v33 }
 0x2b9   :  { %1406 = vmatprep.subr.bf16.mxu1 %v1480_v17 }
 0x2bc   :  { %1408 = vmatpush3.bf16.msra.mxu1 %v1407_v29 }
 0x2bd   :  { %1421 = vmatprep.subr.bf16.mxu1 %v1480_v17 }
 0x38a   :  { %v1265_v12 = vpop.f32.mrb[4].mxu1 }
 0x38b   :  { %v387_v13 = vpop.f32.mrb[5].mxu1 }
 0x38c   :  { %1274 = vmatprep.mubr.msk.f32.mxu0 %vm407_vm3, %v387_v13 }
 0x38d   :  { %1275 = vmatmul.mubr.msk.f32.vlgmr.msra.gmra.mrb[2].mxu0 %vm407_vm3, %v1265_v12 }
 0x38e   :  { %1411 = vmatpush3.bf16.msra.mxu0 %v1410_v16  ;;  %1304 = vmatprep.mubr.msk.f32.mxu0 %vm1481_vm4, %v1482_v33 }
 0x38f   :  { %1412 = vmatprep.subr.bf16.mxu0 %v1480_v17 }
 0x392   :  { %1414 = vmatpush3.bf16.msra.mxu0 %v1413_v20 }
 0x393   :  { %1415 = vmatprep.subr.bf16.mxu0 %v1480_v17 }
 0x396   :  { %1417 = vmatpush3.bf16.msra.mxu0 %v1416_v26 }
 0x397   :  { %1418 = vmatprep.subr.bf16.mxu0 %v1480_v17 }
 0x39a   :  { %1420 = vmatpush3.bf16.msra.mxu0 %v1419_v32 }
 0x39b   :  { %1433 = vmatprep.subr.bf16.mxu0 %v1480_v17 }
 0x39d   :  { %1305 = vmatmul.mubr.msk.f32.vlgmr.msra.gmra.mrb[4].mxu0 %vm237_vm2, %v604_v34 }
 0x39e   :  { %1337 = vmatprep.mubr.msk.f32.mxu0 %vm1481_vm4, %v1482_v33 }
 0x460   :  { %v1276_v43 = vpop.f32.mrb[2].mxu0 }
 0x461   :  { %v486_v44 = vadd.f32 %v1276_v43, %v406_v40  ;;  %v480_v45 = vpop.f32.mrb[3].mxu0  ;;  %v1425_v43 = vpack.c.bf16 %v769_v39, %v768_v38 }
 0x462   :  { %v481_v47 = vadd.f32 %v480_v45, %v405_v42  ;;  %v846_v45 = vld [vmem:[%s1796_s5 + $0x150] sm:$0xff] }
 0x463   :  { %v490_v48 = vmax.f32 %v486_v44, 0.0 }
 0x464   :  { %v489_v49 = vmax.f32 %v481_v47, 0.0  ;;  %v1428_v47 = vpack.c.bf16 %v847_v46, %v846_v45 }
 0x465   :  { %v513_v50 = vsel %vm507_vm5, -1e+12, %v490_v48  ;;  %v551_v52 = vsel %vm545_vm6, -1e+12, %v490_v48  ;;  %v589_v54 = vsel %vm583_vm7, -1e+12, %v490_v48 }
 0x466   :  { %v521_v53 = vsel %vm407_vm3, %v513_v50, -inf  ;;  %v559_v51 = vsel %vm407_vm3, %v551_v52, -inf  ;;  %v512_v55 = vsel %vm506_vm9, -1e+12, %v489_v49  ;;  %v550_v56 = vsel %vm544_vm8, -1e+12, %v489_v49 }
 0x467   :  { %v522_v57 = vrot.slane %v521_v53, 4  ;;  %v560_v58 = vrot.slane %v559_v51, 4  ;;  %v514_v59 = vsel %vm407_vm3, %v512_v55, -inf  ;;  %v552_v60 = vsel %vm407_vm3, %v550_v56, -inf  ;;  %v848_v48 = vld [vmem:[%s1796_s5 + $0x160] sm:$0xff]  ;;  %v935_v56 = vld [vmem:[%s1796_s5 + $0x188] sm:$0xff] }
 0x468   :  { %v515_v61 = vrot.slane %v514_v59, 4  ;;  %v553_v62 = vrot.slane %v552_v60, 4  ;;  %v597_v63 = vsel %vm407_vm3, %v589_v54, -inf  ;;  %v588_v0 = vsel %vm582_vm10, -1e+12, %v489_v49  ;;  %v849_v49 = vld [vmem:[%s1796_s5 + $0x168] sm:$0xff] }
 0x469   :  { %v523_v1 = vmax.f32 %v521_v53, %v522_v57  ;;  %v561_v2 = vmax.f32 %v559_v51, %v560_v58  ;;  %v598_v3 = vrot.slane %v597_v63, 4  ;;  %v590_v4 = vsel %vm407_vm3, %v588_v0, -inf  ;;  %v933_v53 = vld [vmem:[%s1796_s5 + $0x178] sm:$0xff]  ;;  %v934_v51 = vld [vmem:[%s1796_s5 + $0x180] sm:$0xff] }
 0x46a   :  { %v516_v5 = vmax.f32 %v514_v59, %v515_v61  ;;  %v554_v6 = vmax.f32 %v552_v60, %v553_v62  ;;  %v591_v7 = vrot.slane %v590_v4, 4  ;;  %v1431_v50 = vpack.c.bf16 %v849_v49, %v848_v48  ;;  %v1016_v58 = vld [vmem:[%s1796_s5 + $0x1a0] sm:$0xff]  ;;  %v1017_v59 = vld [vmem:[%s1796_s5 + $0x1a8] sm:$0xff] }
 0x46b   :  { %v524_v8 = vrot.slane %v523_v1, 2  ;;  %v562_v9 = vrot.slane %v561_v2, 2  ;;  %v599_v10 = vmax.f32 %v597_v63, %v598_v3  ;;  %v1434_v55 = vpack.c.bf16 %v934_v51, %v933_v53 }
 0x46c   :  { %v517_v11 = vrot.slane %v516_v5, 2  ;;  %v555_v12 = vrot.slane %v554_v6, 2  ;;  %v592_v13 = vmax.f32 %v590_v4, %v591_v7  ;;  %v1440_v60 = vpack.c.bf16 %v1017_v59, %v1016_v58  ;;  %v1132_v4 = vld [vmem:[%s1796_s5 + $0x170] ss:$0 sm:$0xff] }
 0x46d   :  { %v525_v14 = vmax.f32 %v523_v1, %v524_v8  ;;  %v563_v15 = vmax.f32 %v561_v2, %v562_v9  ;;  %v600_v16 = vrot.slane %v599_v10, 2  ;;  %1435 = vmatpush3.bf16.msra.mxu0 %v1434_v55  ;;  %v1019_v9 = vld [vmem:[%s1796_s5 + $0x1b8] sm:$0xff] }
 0x46e   :  { %v518_v18 = vmax.f32 %v516_v5, %v517_v11  ;;  %v556_v19 = vmax.f32 %v554_v6, %v555_v12  ;;  %v593_v20 = vrot.slane %v592_v13, 2  ;;  %1436 = vmatprep.subr.bf16.mxu0 %v1480_v17  ;;  %v1133_v11 = vld [vmem:[%s1796_s5 + $0x198] ss:$0 sm:$0xff] }
 0x46f   :  { %v526_v21 = vrot.slane %v525_v14, 1  ;;  %v564_v22 = vrot.slane %v563_v15, 1  ;;  %v601_v23 = vmax.f32 %v599_v10, %v600_v16  ;;  %v1135_v16 = vld [vmem:[%s1796_s5 + $0x1c0] ss:$0 sm:$0xff] }
 0x470   :  { %v519_v26 = vrot.slane %v518_v18, 1  ;;  %v557_v27 = vrot.slane %v556_v19, 1  ;;  %v594_v28 = vmax.f32 %v592_v13, %v593_v20  ;;  %v762_v52 = vpop.f32.mrb[4].mxu0 }
 0x471   :  { %v602_v29 = vrot.slane %v601_v23, 1  ;;  %v527_v30 = vmax.f32 %v525_v14, %v526_v21  ;;  %v565_v31 = vmax.f32 %v563_v15, %v564_v22  ;;  %v1306_v54 = vpop.f32.mrb[5].mxu0 }
 0x472   :  { %v595_v32 = vrot.slane %v594_v28, 1  ;;  %v520_v34 = vmax.f32 %v518_v18, %v519_v26  ;;  %v558_v36 = vmax.f32 %v556_v19, %v557_v27 }
 0x473   :  { %v603_v37 = vmax.f32 %v601_v23, %v602_v29 }
 0x474   :  { %v596_v40 = vmax.f32 %v594_v28, %v595_v32  ;;  %v620_v41 = vsel %vm619_vm11, %v527_v30, %v520_v34  ;;  %v772_v42 = vsel %vm619_vm11, %v565_v31, %v558_v36 }
 0x475   :  { %1286 = vmatmul.mubr.msk.f32.vlgmr.msra.gmra.mrb[6].mxu1 %vm407_vm3, %v620_v41 }
 0x476   :  { %1423 = vmatpush3.bf16.msra.mxu1 %v1422_v35  ;;  %1315 = vmatprep.mubr.msk.f32.mxu1 %vm1481_vm4, %v1482_v33  ;;  %v852_v44 = vsel %vm619_vm11, %v603_v37, %v596_v40 }
 0x477   :  { %1424 = vmatprep.subr.bf16.mxu1 %v1480_v17 }
 0x47a   :  { %1426 = vmatpush3.bf16.msra.mxu1 %v1425_v43 }
 0x47b   :  { %1427 = vmatprep.subr.bf16.mxu1 %v1480_v17 }
 0x47d   :  { %1316 = vmatmul.mubr.msk.f32.vlgmr.msra.gmra.mrb[8].mxu1 %vm407_vm3, %v772_v42 }
 0x47e   :  { %1429 = vmatpush3.bf16.msra.mxu1 %v1428_v47  ;;  %1326 = vmatprep.mubr.msk.f32.mxu1 %vm1481_vm4, %v1482_v33 }
 0x47f   :  { %1430 = vmatprep.subr.bf16.mxu1 %v1480_v17 }
 0x482   :  { %1432 = vmatpush3.bf16.msra.mxu1 %v1431_v50 }
 0x483   :  { %1439 = vmatprep.subr.bf16.mxu1 %v1480_v17 }
 0x485   :  { %1327 = vmatmul.mubr.msk.f32.vlgmr.msra.gmra.mrb[10].mxu1 %vm407_vm3, %v852_v44 }
 0x486   :  { %1348 = vmatprep.mubr.msk.f32.mxu1 %vm1481_vm4, %v1482_v33  ;;  %v936_v33 = vld [vmem:[%s1796_s5 + $0x190] sm:$0xff]  ;;  %1441 = vmatpush3.bf16.msra.mxu1 %v1440_v60 }
 0x487   :  { %v1437_v57 = vpack.c.bf16 %v936_v33, %v935_v56  ;;  %1442 = vmatprep.subr.bf16.mxu1 %v1480_v17  ;;  %v1018_v17 = vld [vmem:[%s1796_s5 + $0x1b0] sm:$0xff] }
 0x488   :  { %v1443_v10 = vpack.c.bf16 %v1019_v9, %v1018_v17 }
 0x489   :  { %1438 = vmatpush3.bf16.msra.mxu0 %v1437_v57 }
 0x48a   :  { %1444 = vmatpush3.bf16.msra.mxu1 %v1443_v10 }
 0x548   :  { %v689_v61 = vpop.f32.mrb[6].mxu1 }
 0x549   :  { %v763_v62 = vadd.f32 %v762_v52, %v689_v61  ;;  %v1287_v63 = vpop.f32.mrb[7].mxu1 }
 0x550   :  { %v841_v0 = vpop.f32.mrb[8].mxu1 }
 0x551   :  { %v845_v1 = vadd.f32 %v841_v0, %v763_v62  ;;  %v1317_v2 = vpop.f32.mrb[9].mxu1 }
 0x558   :  { %v921_v3 = vpop.f32.mrb[10].mxu1 }
 0x559   :  { %v925_v5 = vadd.f32 %v921_v3, %v845_v1  ;;  %v1328_v6 = vpop.f32.mrb[11].mxu1 }
 0x55b   :  { %v931_v7 = vadd.f32 %v1132_v4, %v925_v5 }
 0x55d   :  { %v932_v8 = vmax.f32 %v931_v7, 0.0 }
 0x55f   :  { %1338 = vmatmul.mubr.msk.f32.vlgmr.msra.gmra.mrb[6].mxu0 %vm407_vm3, %v932_v8 }
 0x632   :  { %v1011_v12 = vpop.f32.mrb[6].mxu0 }
 0x633   :  { %v1012_v13 = vadd.f32 %v1133_v11, %v1011_v12  ;;  %v1339_v14 = vpop.f32.mrb[7].mxu0 }
 0x635   :  { %v1015_v15 = vmax.f32 %v1012_v13, 0.0 }
 0x637   :  { %1349 = vmatmul.mubr.msk.f32.vlgmr.msra.gmra.mrb[12].mxu1 %vm407_vm3, %v1015_v15 }
 0x70a   :  { %v1094_v18 = vpop.f32.mrb[12].mxu1 }
 0x70b   :  { %v1095_v19 = vadd.f32 %v1135_v16, %v1094_v18  ;;  %v1350_v20 = vpop.f32.mrb[13].mxu1 }
 0x70d   :  { %1098 = vst [vmem:[#allocation2] sm:$0x3] %v1095_v19 }
 0x70e   :  { %1466 = shalt.err (!%p1463_p4)
}
 0x70f   :  { %s1467_s24 = scalar_lea.hbm %s1797_s6, 32 }
 0x710   :  { %p1468_p5 = scmp.ne.s32.totalorder %s1797_s6, %s1467_s24  ;;  %p1471_p6 = scmp.lt.u32.totalorder %s1467_s24, %s1797_s6 }
 0x712   :  { %p1473_p7 = pnand %p1471_p6, %p1468_p5 }
 0x714   :  { %1476 = shalt.err (!%p1473_p7)
}
 0x715   :  { %1108 = dma.vmem_to_hbm [thread:$0]  %s1106_s20, 32, %s1797_s6, [#allocation3]  }
 0x716   :  { %1477 = dma.done.wait [#allocation3], 32  }
 0x717   :  { %1478 = vsyncadd [#allocation3], 4294967264 }
 0x718   :  { %1112 = vsyncpa [#allocation3], 1 }

</bundles_post_ra>
